<compile_context>
chip_gen: v5e
topology: v5e:2x2
jax: 0.10.0
libtpu: 0.0.40
codegen_flags: <defaults>
</compile_context>

<pallas_src>
from functools import partial

import jax
import jax.numpy as jnp
from jax.experimental import pallas as pl
from jax.experimental.pallas import tpu as pltpu


# ----------------------------------------------------------------------------
# Single-pass kernel: one (Bt, C, HW) slab per grid step.
# ----------------------------------------------------------------------------
def _se_kernel(x_ref, w1t_ref, b1_ref, w2t_ref, b2_ref, o_ref):
    # AdaptiveAvgPool2d(1): lane reduction with f32 accumulation (no full f32
    # copy of the block is kept live).  1/HW is pre-folded into w1t.
    pooled = jnp.sum(x_ref[...], axis=2, dtype=jnp.float32)           # (Bt, C)

    # fc1 (1x1 conv) + ReLU: (Bt, C) @ (C, S) + b1
    h = jnp.dot(pooled, w1t_ref[...],
                preferred_element_type=jnp.float32) + b1_ref[...]     # (Bt, S)
    h = jnp.maximum(h, 0.0)

    # fc2 (1x1 conv) + Sigmoid: (Bt, S) @ (S, C) + b2
    s = jnp.dot(h, w2t_ref[...],
                preferred_element_type=jnp.float32) + b2_ref[...]     # (Bt, C)
    s = jax.nn.sigmoid(s)

    # scale * input, re-reading x in its native dtype (bf16 stays bf16).
    o_ref[...] = x_ref[...] * s.astype(o_ref.dtype)[:, :, None]


# ----------------------------------------------------------------------------
# Two-pass fallback for oversized single images.
# Pass 1: pooled sum accumulated over HW chunks; scale computed on last chunk.
# ----------------------------------------------------------------------------
def _se_pool_kernel(x_ref, w1t_ref, b1_ref, w2t_ref, b2_ref, s_ref, acc_ref,
                    *, hw, hw_chunk):
    h_idx = pl.program_id(1)

    @pl.when(h_idx == 0)
    def _init():
        acc_ref[...] = jnp.zeros_like(acc_ref)

    x = x_ref[...]                                                    # (1, C, hw_chunk)
    if hw % hw_chunk != 0:
        # Explicitly mask the ragged last HW chunk (OOB block lanes are
        # undefined and would otherwise pollute the pooled sum).
        lane = jax.lax.broadcasted_iota(jnp.int32, x.shape, 2)
        valid = (h_idx * hw_chunk + lane) < hw
        x = jnp.where(valid, x, jnp.zeros_like(x))
    acc_ref[...] += jnp.sum(x, axis=2, dtype=jnp.float32)             # (1, C)

    @pl.when(h_idx == pl.num_programs(1) - 1)
    def _finish():
        pooled = acc_ref[...]                                          # (1, C); 1/HW folded in w1t
        h1 = jnp.dot(pooled, w1t_ref[...],
                     preferred_element_type=jnp.float32) + b1_ref[...]
        h1 = jnp.maximum(h1, 0.0)
        s = jnp.dot(h1, w2t_ref[...],
                    preferred_element_type=jnp.float32) + b2_ref[...]
        s = jax.nn.sigmoid(s)                                          # (1, C)
        s_ref[...] = s[:, None, :]                                     # (1, 1, C)


# Pass 2: re-read x in chunks and scale.
def _se_scale_kernel(x_ref, s_ref, o_ref):
    s = s_ref[...][:, 0, :]                                            # (1, C)
    o_ref[...] = x_ref[...] * s.astype(o_ref.dtype)[:, :, None]


# ----------------------------------------------------------------------------
# VMEM sizing: per-generation (v5e/v6e: 128 MiB physical; v7x: 64 MiB).
# ----------------------------------------------------------------------------
def _vmem_budget():
    try:
        phys = int(pltpu.get_tpu_info().vmem_capacity_bytes)
    except Exception:
        phys = 64 * 1024 * 1024                      # conservative (v7x)
    limit = min(phys - 16 * 1024 * 1024, 96 * 1024 * 1024)
    limit = max(limit, 32 * 1024 * 1024)
    # 2x(in) + 2x(out) double buffers must fit well under the scoped limit,
    # leaving headroom for weights and Mosaic internal scratch.
    block_budget = (3 * limit) // 4
    return block_budget, limit


# ----------------------------------------------------------------------------
# Wrapper
# ----------------------------------------------------------------------------
def squeeze_excitation(x, w1, b1, w2, b2, *,
                       force_two_pass=False, two_pass_hw_chunk=None):
    """x: (B, C, H, W). Weights: w1 (S, C), b1 (S,), w2 (C, S), b2 (C,)."""
    B, C, H, W = x.shape
    S = w1.shape[0]
    HW = H * W
    itemsize = jnp.dtype(x.dtype).itemsize

    x_flat = x.reshape(B, C, HW)                     # no padding, no copy

    # Row-oriented f32 parameters; fold the 1/HW pooling divisor into w1t.
    w1t = w1.astype(jnp.float32).T * (1.0 / float(HW))   # (C, S)
    w2t = w2.astype(jnp.float32).T                        # (S, C)
    b1r = b1.reshape(1, S).astype(jnp.float32)
    b2r = b2.reshape(1, C).astype(jnp.float32)
    param_bytes = 4 * int(w1t.size + w2t.size + b1r.size + b2r.size)

    block_budget, vmem_limit = _vmem_budget()
    per_image_bytes = C * HW * itemsize
    single_pass = (4 * per_image_bytes + param_bytes <= block_budget) and not force_two_pass

    if single_pass:
        Bt = max(1, min(B, (block_budget - param_bytes) // (4 * per_image_bytes)))
        if B >= 2:
            # Keep >=2 grid steps so v7x's two TensorCores both get work
            # (negligible extra step overhead on 1-TC chips).
            Bt = min(Bt, pl.cdiv(B, 2))
        grid = (pl.cdiv(B, Bt),)

        cost = pl.CostEstimate(
            flops=int(2 * B * C * HW + 4 * B * C * S),
            bytes_accessed=int(2 * B * C * HW * itemsize + param_bytes),
            transcendentals=int(B * C),
        )

        out_flat = pl.pallas_call(
            _se_kernel,
            out_shape=jax.ShapeDtypeStruct((B, C, HW), x.dtype),
            grid_spec=pltpu.PrefetchScalarGridSpec(
                num_scalar_prefetch=0,
                grid=grid,
                in_specs=[
                    pl.BlockSpec((Bt, C, HW), lambda b: (b, 0, 0)),
                    pl.BlockSpec((C, S), lambda b: (0, 0)),
                    pl.BlockSpec((1, S), lambda b: (0, 0)),
                    pl.BlockSpec((S, C), lambda b: (0, 0)),
                    pl.BlockSpec((1, C), lambda b: (0, 0)),
                ],
                out_specs=pl.BlockSpec((Bt, C, HW), lambda b: (b, 0, 0)),
            ),
            compiler_params=pltpu.CompilerParams(
                dimension_semantics=("parallel",),
                vmem_limit_bytes=vmem_limit,
            ),
            cost_estimate=cost,
        )(x_flat, w1t, b1r, w2t, b2r)
        return out_flat.reshape(B, C, H, W)

    # ---------------- Two-pass chunked fallback (oversized single image) ----
    if two_pass_hw_chunk is not None:
        hw_chunk = int(two_pass_hw_chunk)
    else:
        hw_chunk = max(128, ((block_budget // (4 * C * itemsize)) // 128) * 128)
    hw_chunk = min(hw_chunk, pl.cdiv(HW, 128) * 128)
    n_hw = pl.cdiv(HW, hw_chunk)

    pool_kernel = partial(_se_pool_kernel, hw=HW, hw_chunk=hw_chunk)
    s = pl.pallas_call(
        pool_kernel,
        out_shape=jax.ShapeDtypeStruct((B, 1, C), jnp.float32),
        grid_spec=pltpu.PrefetchScalarGridSpec(
            num_scalar_prefetch=0,
            grid=(B, n_hw),
            in_specs=[
                pl.BlockSpec((1, C, hw_chunk), lambda b, h: (b, 0, h)),
                pl.BlockSpec((C, S), lambda b, h: (0, 0)),
                pl.BlockSpec((1, S), lambda b, h: (0, 0)),
                pl.BlockSpec((S, C), lambda b, h: (0, 0)),
                pl.BlockSpec((1, C), lambda b, h: (0, 0)),
            ],
            out_specs=pl.BlockSpec((1, 1, C), lambda b, h: (b, 0, 0)),
            scratch_shapes=[pltpu.VMEM((1, C), jnp.float32)],
        ),
        compiler_params=pltpu.CompilerParams(
            dimension_semantics=("parallel", "arbitrary"),
            vmem_limit_bytes=vmem_limit,
        ),
        cost_estimate=pl.CostEstimate(
            flops=int(B * C * HW + 4 * B * C * S),
            bytes_accessed=int(B * C * HW * itemsize + param_bytes + 4 * B * C),
            transcendentals=int(B * C),
        ),
    )(x_flat, w1t, b1r, w2t, b2r)

    out_flat = pl.pallas_call(
        _se_scale_kernel,
        out_shape=jax.ShapeDtypeStruct((B, C, HW), x.dtype),
        grid_spec=pltpu.PrefetchScalarGridSpec(
            num_scalar_prefetch=0,
            grid=(B, n_hw),
            in_specs=[
                pl.BlockSpec((1, C, hw_chunk), lambda b, h: (b, 0, h)),
                pl.BlockSpec((1, 1, C), lambda b, h: (b, 0, 0)),
            ],
            out_specs=pl.BlockSpec((1, C, hw_chunk), lambda b, h: (b, 0, h)),
        ),
        compiler_params=pltpu.CompilerParams(
            dimension_semantics=("parallel", "parallel"),
            vmem_limit_bytes=vmem_limit,
        ),
        cost_estimate=pl.CostEstimate(
            flops=int(B * C * HW),
            bytes_accessed=int(2 * B * C * HW * itemsize + 4 * B * C),
            transcendentals=0,
        ),
    )(x_flat, s)
    return out_flat.reshape(B, C, H, W)


# ----------------------------------------------------------------------------
# Pure-JAX reference
# ----------------------------------------------------------------------------
def _reference(x, w1, b1, w2, b2):
    pooled = jnp.mean(x, axis=(2, 3))                       # (B, C)
    h = jnp.maximum(pooled @ w1.T + b1, 0.0)                # (B, S)
    s = jax.nn.sigmoid(h @ w2.T + b2)                       # (B, C)
    return x * s[:, :, None, None]


if __name__ == "__main__":
    keys = jax.random.split(jax.random.PRNGKey(0), 10)

    def make_case(ks, B, C, H, W, S):
        x = jax.random.normal(ks[0], (B, C, H, W), dtype=jnp.float32)
        w1 = jax.random.normal(ks[1], (S, C), dtype=jnp.float32) * (C ** -0.5)
        b1 = jax.random.normal(ks[2], (S,), dtype=jnp.float32) * 0.1
        w2 = jax.random.normal(ks[3], (C, S), dtype=jnp.float32) * (S ** -0.5)
        b2 = jax.random.normal(ks[4], (C,), dtype=jnp.float32) * 0.1
        return x, w1, b1, w2, b2

    # Case 1: nominal small config (batch=2, channels=4, spatial=16, squeeze=2).
    args1 = make_case(keys[0:5], B=2, C=4, H=16, W=16, S=2)
    out1 = jax.block_until_ready(squeeze_excitation(*args1))
    ref1 = _reference(*args1)
    assert out1.shape == args1[0].shape
    assert jnp.allclose(out1, ref1, atol=1e-5, rtol=1e-5)

    # Case 2: non-128-aligned HW (12*12=144) + ragged last batch block (B=3, Bt=2):
    # the un-padded fast path requested by the perf review.
    args2 = make_case(keys[5:10], B=3, C=8, H=12, W=12, S=4)
    out2 = jax.block_until_ready(squeeze_excitation(*args2))
    ref2 = _reference(*args2)
    assert jnp.allclose(out2, ref2, atol=1e-5, rtol=1e-5)

    # Case 3: force the chunked two-pass fallback (oversized-image path),
    # including the ragged last HW chunk (144 % 128 != 0).
    out3 = jax.block_until_ready(
        squeeze_excitation(*args2, force_two_pass=True, two_pass_hw_chunk=128))
    assert jnp.allclose(out3, ref2, atol=1e-5, rtol=1e-5)

    print("KERNEL_OK")
</pallas_src>

<mosaic_0001>
module attributes {stable_mosaic.version = 11 : i64} {
  func.func @_se_kernel(%arg0: i32, %arg1: memref<1x4x256xf32, #tpu.memory_space<vmem>>, %arg2: memref<4x2xf32, #tpu.memory_space<vmem>>, %arg3: memref<1x2xf32, #tpu.memory_space<vmem>>, %arg4: memref<2x4xf32, #tpu.memory_space<vmem>>, %arg5: memref<1x4xf32, #tpu.memory_space<vmem>>, %arg6: memref<1x4x256xf32, #tpu.memory_space<vmem>>) attributes {dimension_semantics = [#tpu.dimension_semantics<parallel>], iteration_bounds = array<i64: 2>, scalar_prefetch = 0 : i64, scratch_operands = 0 : i64, tpu.core_type = #tpu.core_type<tc>, window_params = [{transform_indices = @transform_0, window_bounds = array<i64: 1, 4, 256>}, {pipeline_mode = #tpu.pipeline_mode<synchronous>, transform_indices = @transform_1, window_bounds = array<i64: 4, 2>}, {pipeline_mode = #tpu.pipeline_mode<synchronous>, transform_indices = @transform_2, window_bounds = array<i64: 1, 2>}, {pipeline_mode = #tpu.pipeline_mode<synchronous>, transform_indices = @transform_3, window_bounds = array<i64: 2, 4>}, {pipeline_mode = #tpu.pipeline_mode<synchronous>, transform_indices = @transform_4, window_bounds = array<i64: 1, 4>}, {transform_indices = @transform_5, window_bounds = array<i64: 1, 4, 256>}]} {
    %c0 = arith.constant 0 : index
    %c0_0 = arith.constant 0 : index
    %c0_1 = arith.constant 0 : index
    %0 = vector.load %arg1[%c0, %c0_0, %c0_1] : memref<1x4x256xf32, #tpu.memory_space<vmem>>, vector<1x4x256xf32>
    %cst = arith.constant dense<0.000000e+00> : vector<1x4xf32>
    %1 = vector.multi_reduction <add>, %0, %cst [2] : vector<1x4x256xf32> to vector<1x4xf32>
    %c0_2 = arith.constant 0 : index
    %c0_3 = arith.constant 0 : index
    %2 = vector.load %arg2[%c0_2, %c0_3] : memref<4x2xf32, #tpu.memory_space<vmem>>, vector<4x2xf32>
    %cst_4 = arith.constant dense<0.000000e+00> : vector<1x2xf32>
    %3 = tpu.matmul %1, %2, %cst_4 {dimension_numbers = #tpu.dot_dimension_numbers<[1], [0], [0], [1], [0, 0, 1, 1], [], []>} : vector<1x4xf32>, vector<4x2xf32>, vector<1x2xf32> -> vector<1x2xf32>
    %c0_5 = arith.constant 0 : index
    %c0_6 = arith.constant 0 : index
    %4 = vector.load %arg3[%c0_5, %c0_6] : memref<1x2xf32, #tpu.memory_space<vmem>>, vector<1x2xf32>
    %5 = arith.addf %3, %4 : vector<1x2xf32>
    %cst_7 = arith.constant 0.000000e+00 : f32
    %6 = vector.broadcast %cst_7 : f32 to vector<1x2xf32>
    %7 = arith.maximumf %5, %6 : vector<1x2xf32>
    %c0_8 = arith.constant 0 : index
    %c0_9 = arith.constant 0 : index
    %8 = vector.load %arg4[%c0_8, %c0_9] : memref<2x4xf32, #tpu.memory_space<vmem>>, vector<2x4xf32>
    %cst_10 = arith.constant dense<0.000000e+00> : vector<1x4xf32>
    %9 = tpu.matmul %7, %8, %cst_10 {dimension_numbers = #tpu.dot_dimension_numbers<[1], [0], [0], [1], [0, 0, 1, 1], [], []>} : vector<1x2xf32>, vector<2x4xf32>, vector<1x4xf32> -> vector<1x4xf32>
    %c0_11 = arith.constant 0 : index
    %c0_12 = arith.constant 0 : index
    %10 = vector.load %arg5[%c0_11, %c0_12] : memref<1x4xf32, #tpu.memory_space<vmem>>, vector<1x4xf32>
    %11 = arith.addf %9, %10 : vector<1x4xf32>
    %12 = arith.negf %11 : vector<1x4xf32>
    %13 = math.exp %12 : vector<1x4xf32>
    %cst_13 = arith.constant 1.000000e+00 : f32
    %14 = vector.broadcast %cst_13 : f32 to vector<1x4xf32>
    %15 = arith.addf %14, %13 : vector<1x4xf32>
    %16 = arith.divf %14, %15 : vector<1x4xf32>
    %c0_14 = arith.constant 0 : index
    %c0_15 = arith.constant 0 : index
    %c0_16 = arith.constant 0 : index
    %17 = vector.load %arg1[%c0_14, %c0_15, %c0_16] : memref<1x4x256xf32, #tpu.memory_space<vmem>>, vector<1x4x256xf32>
    %18 = vector.shape_cast %16 : vector<1x4xf32> to vector<1x4x1xf32>
    %19 = vector.broadcast %18 : vector<1x4x1xf32> to vector<1x4x256xf32>
    %20 = arith.mulf %17, %19 : vector<1x4x256xf32>
    %c0_17 = arith.constant 0 : index
    %c0_18 = arith.constant 0 : index
    %c0_19 = arith.constant 0 : index
    %21 = vector.load %arg6[%c0_17, %c0_18, %c0_19] : memref<1x4x256xf32, #tpu.memory_space<vmem>>, vector<1x4x256xf32>
    tpu.vector_store %arg6[%c0_17, %c0_18, %c0_19], %20 {strides = array<i32>} : memref<1x4x256xf32, #tpu.memory_space<vmem>>, vector<1x4x256xf32>,
    return
  }
  func.func @transform_0(%arg0: i32) -> (i32, i32, i32) {
    %c0_i32 = arith.constant 0 : i32
    %c0_i32_0 = arith.constant 0 : i32
    %c0_i32_1 = arith.constant 0 : i32
    return %arg0, %c0_i32, %c0_i32_0 : i32, i32, i32
  }
  func.func @transform_1(%arg0: i32) -> (i32, i32) {
    %c0_i32 = arith.constant 0 : i32
    %c0_i32_0 = arith.constant 0 : i32
    %c0_i32_1 = arith.constant 0 : i32
    return %c0_i32, %c0_i32_0 : i32, i32
  }
  func.func @transform_2(%arg0: i32) -> (i32, i32) {
    %c0_i32 = arith.constant 0 : i32
    %c0_i32_0 = arith.constant 0 : i32
    %c0_i32_1 = arith.constant 0 : i32
    return %c0_i32, %c0_i32_0 : i32, i32
  }
  func.func @transform_3(%arg0: i32) -> (i32, i32) {
    %c0_i32 = arith.constant 0 : i32
    %c0_i32_0 = arith.constant 0 : i32
    %c0_i32_1 = arith.constant 0 : i32
    return %c0_i32, %c0_i32_0 : i32, i32
  }
  func.func @transform_4(%arg0: i32) -> (i32, i32) {
    %c0_i32 = arith.constant 0 : i32
    %c0_i32_0 = arith.constant 0 : i32
    %c0_i32_1 = arith.constant 0 : i32
    return %c0_i32, %c0_i32_0 : i32, i32
  }
  func.func @transform_5(%arg0: i32) -> (i32, i32, i32) {
    %c0_i32 = arith.constant 0 : i32
    %c0_i32_0 = arith.constant 0 : i32
    %c0_i32_1 = arith.constant 0 : i32
    return %arg0, %c0_i32, %c0_i32_0 : i32, i32, i32
  }
}

</mosaic_0001>

<bundles_post_ra>
// kernel: tpu_custom_call.1
= control target key start
LH: loop header
LB: loop body
LE: loop exit
PB: predicated region body
PF: predicated region fallthrough
CT: control target
= control target key end

     0   :  { %10 = vsyncpa [#allocation3], 0  ;;  %s785_s0 = inlined_call_operand.hbm [shape: f32[2,4,256], index: 0, kind: input, shape index: {}]   ;;  %s786_s1 = inlined_call_operand.vmem [shape: f32[4,2], index: 1, kind: input, shape index: {}]   ;;  %s787_s2 = inlined_call_operand.vmem [shape: f32[1,2], index: 2, kind: input, shape index: {}]   ;;  %s788_s3 = inlined_call_operand.vmem [shape: f32[2,4], index: 3, kind: input, shape index: {}]   ;;  %s789_s4 = inlined_call_operand.vmem [shape: f32[1,4], index: 4, kind: input, shape index: {}]   ;;  %s790_s5 = inlined_call_operand.hbm [shape: f32[2,4,256], index: 5, kind: output, shape index: {}]  }
   0x1   :  { %12 = vsyncpa [#allocation3 + $0x1], 0 }
   0x2   :  { %13 = vsyncpa [#allocation4], 0 }
   0x3   :  { %15 = vsyncpa [#allocation4 + $0x1], 0  ;;  %s642_s18 = smov 0   ;;  %s644_s19 = smov 0  }
   0x4   :  { %s646_s20 = smov 0   ;;  %s648_s21 = smov 0  }
   0x5 LB: > { %s663_s22 = sadd.s32 4294967295, %s609_s21   ;;  %s440_s23 = sadd.s32 4294967294, %s609_s21   ;;  %s609_s21 = sphi %s648_s21, %s800_s21   ;;  %s605_s20 = sphi %s646_s20, %s799_s20   ;;  %s601_s19 = sphi %s644_s19, %s798_s19   ;;  %s597_s18 = sphi %s642_s18, %s797_s18  }
   0x6   : > { %s667_s24 = sadd.s32 1, %s609_s21   ;;  %s28_s25 = sadd.s32 1, %s605_s20 }
   0x7   : > { %s25_s26 = ssub.s32 %s609_s21, %s667_s24  ;;  %p35_p0 = scmp.ne.s32.totalorder %s605_s20, %s601_s19 }
   0x8   : > { %p26_p1 = scmp.eq.s32.totalorder %s25_s26, 0  ;;  %p36_p2 = scmp.eq.s32.totalorder %s609_s21, 0 }
   0x9   : > { %p41_p3 = scmp.ne.s32.totalorder %s601_s19, %s597_s18  ;;  %p42_p4 = scmp.eq.s32.totalorder %s663_s22, 0 }
   0xa   : > { %s679_s27 = scalar_select %p26_p1, %s605_s20, %s28_s25  }
   0xb   : > { %p681_p5 = por %p36_p2, %p35_p0  ;;  %p685_p6 = por %p42_p4, %p41_p3 }
   0xc   : > { %p149_p7 = scmp.eq.s32.totalorder %s663_s22, 1  ;;  %p155_p8 = scmp.eq.s32.totalorder %s440_s23, 1 }
   0xd   : > { %p473_p10 = scmp.lt.s32.totalorder %s609_s21, 2  ;;  %s187_s7 = sand.u32 1, %s605_s20  }
   0xe   : > { %p692_p11 = por %p149_p7, %p35_p0  ;;  %p696_p12 = por %p155_p8, %p41_p3 }
   0xf   : > { %s459_s8 = sshll.u32 %s609_s21, 3  ;;  %s443_s9 = sshll.u32 %s187_s7, 3 }
  0x10   : > { %s196_s12 = scalar_lea.hbm %s785_s0, %s459_s8  ;;  %s191_s14 = scalar_lea.vmem [#allocation2], %s443_s9 }
  0x11   : > { %s198_s13 = sshll.u32 %s196_s12, 4  ;;  %s200_s15 = sshll.u32 %s191_s14, 4  ;;  %s199_s13 = int_to_ptr.hbm [resolvable:$true] %s198_s13  ;;  %s201_s15 = int_to_ptr.vmem [resolvable:$true] %s200_s15 }
  0x12   : > { %p707_p13 = pnand %p473_p10, %p681_p5  ;;  %p446_p0 = scmp.ge.s32.totalorder %s609_s21, 1 }
  0x13   : > { %p205_p1 = scmp.lt.s32.totalorder %s609_s21, 3  ;;  %s188_s17 = scalar_lea.sflag [#allocation3], %s187_s7 }
  0x14   : > { %s513_s23 = sshra.s32 %s199_s13, 4  ;;  %p517_p3 = pneg %p707_p13  ;;  %s514_s23 = int_to_ptr.hbm [resolvable:$true] %s513_s23 }
  0x15   : > { %s515_s25 = scalar_lea.hbm %s514_s23, 8  ;;  %s520_s28 = scalar_lea.hbm %s785_s0, 16 }
  0x16   : > { %p516_p2 = scmp.ne.s32.totalorder %s514_s23, %s515_s25  ;;  %p521_p5 = scmp.lt.s32.totalorder %s514_s23, %s785_s0 }
  0x17   : > { %p522_p8 = scmp.lt.s32.totalorder %s520_s28, %s515_s25 }
  0x18   : > { %p518_p4 = pnand %p517_p3, %p516_p2 }
  0x19   : > { %p523_p10 = por %p522_p8, %p521_p5 }
  0x1a   : > { %p519_p7 = pneg %p518_p4 }
  0x1c   : > { %p524_p9 = pnand %p523_p10, %p519_p7 }
  0x1e   : > { %527 = shalt.err (!%p524_p9)
}
  0x1f   : > { %468 = dma.hbm_to_vmem [thread:$0]  (!%p707_p13), %s199_s13, 128, %s201_s15, %s188_s17  }
  0x20   : > { %p206_p2 = pnand %p446_p0, %p205_p1 }
  0x21   : > { %s728_s7 = sand.u32 (!%p206_p2), 1, %s601_s19  }
  0x22   : > { %209 = sbr.rel (%p206_p2) target bundleno = 580 (0x244), region = 40  ;;  %s447_s11 = sshll.u32 (!%p206_p2), %s728_s7, 3 }
  0x23   : > { %s212_s12 = scalar_lea.sflag (!%p206_p2), [#allocation3], %s728_s7  ;;  %s215_s14 = scalar_lea.vmem (!%p206_p2), [#allocation2], %s447_s11 }
  0x27   : > { %588 = dma.done.wait (%p685_p6), %s212_s12, 128  }
  0x28   : > { %590 = vsyncadd (%p685_p6), %s212_s12, 4294967168  ;;  %v243_v0 = vld [vmem:[%s215_s14] sm:$0xff]  ;;  %vm250_vm0 = vcmask 1043456   ;;  %v256_v6 = vld [vmem:[%s786_s1] sm:$0xf]  ;;  %v259_v7 = vlaneseq  ;;  %vm262_vm1 = vcmask 31744  }
  0x29   : > { %245 = vst [vmem:[#allocation1] ss:$2 sm:$0xff] %v243_v0  ;;  %449 = vmatpush.msk.msra.mxu0 %vm250_vm0, %v256_v6  ;;  %v289_v11 = vld [vmem:[%s788_s3] sm:$0x3]  ;;  %vm295_vm2 = vcmask 1041408   ;;  %vm291_vm3 = vcmask 15360  }
  0x2a   : > { %v260_v8 = vand.u32 127, %v259_v7  ;;  %451 = vmatpush.msk.msra.mxu1 %vm295_vm2, %v289_v11  ;;  %v257_v12 = vld [vmem:[%s787_s2] sm:$0x1]  ;;  %v340_v16 = vshrl.u32 %v259_v7, 7  ;;  %v611_v34 = vmov 839922192  }
  0x2b   : > { %v290_v17 = vld [vmem:[%s789_s4] sm:$0x1]  ;;  %v347_v35 = vunpack.c.l.s4 %v611_v34  ;;  %s460_s8 = sshll.u32 %s663_s22, 3  ;;  %s242_s12 = scalar_lea.vmem [#allocation5], %s447_s11 }
  0x2c   : > { %508 = vset.pattern.permute.xlu0 %v340_v16  ;;  %s365_s10 = scalar_lea.hbm %s790_s5, %s460_s8  ;;  %s367_s14 = sshll.u32 %s242_s12, 4  ;;  %s368_s14 = int_to_ptr.vmem [resolvable:$true] %s367_s14 }
  0x2d   : > { %v348_v36 = vunpack.c.0.s8 %v347_v35  ;;  %s369_s13 = sshll.u32 %s365_s10, 4  ;;  %s354_s15 = scalar_lea.sflag [#allocation4], %s728_s7  ;;  %s370_s13 = int_to_ptr.hbm [resolvable:$true] %s369_s13 }
  0x2e   : > { %s557_s29 = sshra.s32 %s370_s13, 4  ;;  %s563_s23 = scalar_lea.hbm %s790_s5, 16  ;;  %s558_s29 = int_to_ptr.hbm [resolvable:$true] %s557_s29 }
  0x2f   : > { %s559_s22 = scalar_lea.hbm %s558_s29, 8  ;;  %p564_p0 = scmp.lt.s32.totalorder %s558_s29, %s790_s5 }
  0x30   : > { %v246_v1 = vld.sshfl [vmem:[#allocation1] sm:$0xff pattern:$0x75316420]  ;;  %v247_v2 = vld.sshfl [vmem:[#allocation1 + $0x8] sm:$0xff pattern:$0x75316420]  ;;  %p560_p6 = scmp.ne.s32.totalorder %s558_s29, %s559_s22  ;;  %p565_p1 = scmp.lt.s32.totalorder %s563_s23, %s559_s22 }
  0x31   : > { %v251_v3 = vsel %vm250_vm0, %v246_v1, 0.0  ;;  %v252_v4 = vsel %vm250_vm0, %v247_v2, 0.0 }
  0x32   : > { %v253_v5 = vadd.f32 %v252_v4, %v251_v3  ;;  %p561_p9 = pnand %p560_p6, %p692_p11  ;;  %p566_p3 = por %p565_p1, %p564_p0 }
  0x34   : > { %254 = vadd.xlane.f32.xlu0 %v253_v5  ;;  %p562_p13 = pneg %p561_p9 }
  0x36   : > { %p567_p4 = pnand %p566_p3, %p562_p13 }
  0xa7   : > { %v255_v9 = vpop.xlane.xlu0 %254 }
  0xa8   : > { %v261_v10 = vperm.slane %v255_v9, %v260_v8 }
  0xaa   : > { %450 = vmatmul.msk.f32.vlgmr.msra.gmra.mxu0 %vm262_vm1, %v261_v10 }
 0x127   : > { %v285_v13 = vpop.f32.mrf.mxu0 }
 0x128   : > { %v286_v14 = vadd.f32 %v285_v13, %v257_v12 }
 0x12a   : > { %v288_v15 = vmax.f32 %v286_v14, 0.0 }
 0x12c   : > { %452 = vmatmul.msk.f32.vlgmr.msra.gmra.mxu1 %vm291_vm3, %v288_v15 }
 0x1a9   : > { %v316_v18 = vpop.f32.mrf.mxu1 }
 0x1aa   : > { %v317_v19 = vadd.f32 %v316_v18, %v290_v17 }
 0x1ac   : > { %v453_v20 = vmul.f32 -1.442695, %v317_v19 }
 0x1ae   : > { %509 = vpow2.f32 %v453_v20 }
 0x1b4   : > { %v510_v21 = vpop.eup %509 }
 0x1b5   : > { %v322_v22 = vadd.f32 1.0, %v510_v21 }
 0x1b7   : > { %511 = vrcp.f32 %v322_v22  ;;  %v334_v26 = vand.u32 2147483648, %v322_v22  ;;  %v332_v28 = vand.u32 2147483647, %v322_v22  ;;  %vm328_vm5 = vweird.f32 %v322_v22 }
 0x1b9   : > { %v335_v30 = vor.u32 1.1754944e-38, %v334_v26  ;;  %vm333_vm7 = vcmp.eq.f32.partialorder %v332_v28, 8.507059e+37 }
 0x1bd   : > { %v512_v23 = vpop.eup %511 }
 0x1be   : > { %v324_v24 = vmul.f32 %v512_v23, %v322_v22  ;;  %vm329_vm4 = vweird.f32 %v512_v23 }
 0x1bf   : > { %vm330_vm6 = vmor %vm328_vm5, %vm329_vm4 }
 0x1c0   : > { %v325_v25 = vsub.f32 1.0, %v324_v24 }
 0x1c2   : > { %v326_v27 = vmul.f32 %v512_v23, %v325_v25 }
 0x1c4   : > { %v327_v29 = vadd.f32 %v512_v23, %v326_v27 }
 0x1c6   : > { %v331_v31 = vsel %vm330_vm6, %v512_v23, %v327_v29 }
 0x1c7   : > { %v336_v32 = vsel %vm333_vm7, %v335_v30, %v331_v31 }
 0x1c8   : > { %v338_v33 = vperm.slane %v336_v32, 0 }
 0x1ca   : > { %343 = vperm.xlu0 %508, %v338_v33  }
 0x23c   : > { %v344_v37 = vpop.permute.xlu0 %343 }
 0x23d   : > { %v349_v38 = vperm.slane %v344_v37, %v348_v36 }
 0x23f   : > { %v351_v39 = vmul.f32 %v349_v38, %v243_v0 }
 0x241   : > { %352 = vst [vmem:[%s242_s12] sm:$0xff] %v351_v39 }
 0x242   : > { %570 = shalt.err (!%p567_p4)
}
 0x243   : > { %463 = dma.vmem_to_hbm [thread:$0]  (%p692_p11), %s368_s14, 128, %s370_s13, %s354_s15  }
 0x244 PF: > { %s381_s7 = sand.u32 1, %s597_s18   ;;  %p796_p7 = scmp.ge.s32.totalorder %s609_s21, 2 }
 0x245   : > { %s382_s26 = scalar_lea.sflag [#allocation4], %s381_s7 }
 0x246   : > { %p470_p5 = pnand %p796_p7, %p696_p12 }
 0x248   : > { %p471_p8 = pneg %p470_p5 }
 0x24a   : > { %592 = dma.done.wait (%p471_p8), %s382_s26, 128  }
 0x24b   : > { %594 = vsyncadd (%p471_p8), %s382_s26, 4294967168  ;;  %p18_p10 = scmp.ge.s32.totalorder %s667_s24, 4   ;;  %s797_s18 = smov %s601_s19 }
 0x24c   : > { %s798_s19 = smov %s605_s20  ;;  %s799_s20 = smov %s679_s27 }
 0x24d   : > { %s800_s21 = smov %s667_s24  ;;  %20 = sbr.rel (!%p18_p10) target bundleno = 5 (0x5), region = 85 }
 0x252   :  { %388 = vsyncpa [#allocation3], 1 }
 0x253   :  { %390 = vsyncpa [#allocation3 + $0x1], 1 }
 0x254   :  { %391 = vsyncpa [#allocation4], 1 }
 0x255   :  { %393 = vsyncpa [#allocation4 + $0x1], 1 }

</bundles_post_ra>
